<compile_context>
chip_gen: v5e
topology: v5e:2x2
jax: 0.10.0
libtpu: 0.0.40
codegen_flags: <defaults>
</compile_context>

<pallas_src>
from functools import partial

import numpy as np
import jax
import jax.numpy as jnp
from jax.experimental import pallas as pl
from jax.experimental.pallas import tpu as pltpu


# ----------------------------------------------------------------------------
# helpers
# ----------------------------------------------------------------------------

def _round_up(x, m):
    return (x + m - 1) // m * m


HEAD_NAMES = ("xyz", "rot", "color", "scale", "opacity")


# ----------------------------------------------------------------------------
# Fused Pallas kernel: 3 matmuls + per-head activations, lane-dense output
# ----------------------------------------------------------------------------

def _fused_heads_kernel(x_ref, w1_ref, b1_ref, w2_ref, b2_ref, w3_ref, b3_ref,
                        o_ref, *, tanh_stop, sig_start, sig_stop):
    # stage 1: x @ W1_cat  (all five first layers at once), ReLU
    h1 = jnp.dot(x_ref[...], w1_ref[...],
                 preferred_element_type=jnp.float32) + b1_ref[...]
    h1 = jnp.maximum(h1, 0.0)

    # stage 2: block-diagonal W2 (each head sees only its own hidden chunk), ReLU
    h2 = jnp.dot(h1.astype(jnp.bfloat16), w2_ref[...],
                 preferred_element_type=jnp.float32) + b2_ref[...]
    h2 = jnp.maximum(h2, 0.0)

    # stage 3: packed lane-dense W3 -> one (tile_n, 128) output slab
    y = jnp.dot(h2.astype(jnp.bfloat16), w3_ref[...],
                preferred_element_type=jnp.float32) + b3_ref[...]

    # per-head output activations, selected by lane index:
    #   lanes [0, tanh_stop)        : xyz   -> tanh(y) / 10
    #   lanes [sig_start, sig_stop) : color -> sigmoid(y)
    #   everything else             : identity (rot / scale / opacity / padding)
    col = jax.lax.broadcasted_iota(jnp.int32, y.shape, 1)
    y_tanh = jnp.tanh(y) * 0.1
    y_sig = 1.0 / (1.0 + jnp.exp(-y))          # exp -> EUP slot
    o_ref[...] = jnp.where(col < tanh_stop, y_tanh,
                           jnp.where((col >= sig_start) & (col < sig_stop),
                                     y_sig, y))


# ----------------------------------------------------------------------------
# Parameters: torch-like per-head Linear init, then pack for the fused kernel
# ----------------------------------------------------------------------------

def init_params(key, input_dim, hidden_dim, color_dim):
    """Per-head parameters exactly mirroring the torch module layout."""
    h2 = hidden_dim // 2
    out_dims = [3, 4, color_dim, 3, 1]

    def lin(kw, kb, fi, fo):
        lim = 1.0 / np.sqrt(fi)
        w = jax.random.uniform(kw, (fi, fo), jnp.float32, -lim, lim)
        b = jax.random.uniform(kb, (fo,), jnp.float32, -lim, lim)
        return w, b

    heads = []
    keys = jax.random.split(key, len(out_dims))
    for k, od in zip(keys, out_dims):
        k1, k2, k3, k4, k5, k6 = jax.random.split(k, 6)
        w1, b1 = lin(k1, k2, input_dim, hidden_dim)
        w2, b2 = lin(k3, k4, hidden_dim, h2)
        w3, b3 = lin(k5, k6, h2, od)
        heads.append(dict(w1=w1, b1=b1, w2=w2, b2=b2, w3=w3, b3=b3))
    return heads, out_dims


def pack_params(heads, out_dims, input_dim, hidden_dim):
    """Merge the 5 heads into 3 padded, MXU-friendly weight matrices (bf16)."""
    H = hidden_dim
    H2 = hidden_dim // 2
    n_heads = len(heads)

    d_pad = _round_up(input_dim, 128)            # padded feature dim
    hc_pad = _round_up(n_heads * H, 128)         # padded concat hidden 1
    h2c_pad = _round_up(n_heads * H2, 128)       # padded concat hidden 2
    out_pack = _round_up(sum(out_dims), 128)     # lane-dense packed output

    w1 = np.zeros((d_pad, hc_pad), np.float32)
    b1 = np.zeros((1, hc_pad), np.float32)
    w2 = np.zeros((hc_pad, h2c_pad), np.float32)
    b2 = np.zeros((1, h2c_pad), np.float32)
    w3 = np.zeros((h2c_pad, out_pack), np.float32)
    b3 = np.zeros((1, out_pack), np.float32)

    offsets = {}
    off = 0
    for i, (hd, od, name) in enumerate(zip(heads, out_dims, HEAD_NAMES)):
        w1[:input_dim, i * H:(i + 1) * H] = np.asarray(hd["w1"])
        b1[0, i * H:(i + 1) * H] = np.asarray(hd["b1"])
        w2[i * H:(i + 1) * H, i * H2:(i + 1) * H2] = np.asarray(hd["w2"])
        b2[0, i * H2:(i + 1) * H2] = np.asarray(hd["b2"])
        w3[i * H2:(i + 1) * H2, off:off + od] = np.asarray(hd["w3"])
        b3[0, off:off + od] = np.asarray(hd["b3"])
        offsets[name] = off
        off += od

    packed = dict(
        w1=jnp.asarray(w1, jnp.bfloat16),
        b1=jnp.asarray(b1, jnp.float32),
        w2=jnp.asarray(w2, jnp.bfloat16),
        b2=jnp.asarray(b2, jnp.float32),
        w3=jnp.asarray(w3, jnp.bfloat16),
        b3=jnp.asarray(b3, jnp.float32),
    )
    meta = dict(
        input_dim=input_dim,
        d_pad=d_pad,
        out_pack=out_pack,
        offsets=offsets,
        out_dims=dict(zip(HEAD_NAMES, out_dims)),
    )
    return packed, meta


# ----------------------------------------------------------------------------
# Forward pass wrapper (single fused pallas_call)
# ----------------------------------------------------------------------------

def gaussian_param_predictor_forward(packed, meta, x, *, tile_n=512):
    n, din = x.shape
    d_pad = meta["d_pad"]
    out_pack = meta["out_pack"]

    # bf16 activations for the matmuls (halves x DMA bytes); padding is zeros
    xp = x.astype(jnp.bfloat16)
    if d_pad != din:
        xp = jnp.pad(xp, ((0, 0), (0, d_pad - din)))

    # row tiling: tile must be a multiple of 8 (sublane), pad N up to a multiple
    tn = min(tile_n, _round_up(n, 8))
    n_pad = _round_up(n, tn)
    if n_pad != n:
        xp = jnp.pad(xp, ((0, n_pad - n), (0, 0)))

    offs = meta["offsets"]
    dims = meta["out_dims"]
    kernel = partial(_fused_heads_kernel,
                     tanh_stop=offs["xyz"] + dims["xyz"],
                     sig_start=offs["color"],
                     sig_stop=offs["color"] + dims["color"])

    def full(shape):
        return pl.BlockSpec(shape, lambda i: (0, 0))

    out = pl.pallas_call(
        kernel,
        out_shape=jax.ShapeDtypeStruct((n_pad, out_pack), jnp.float32),
        grid=(n_pad // tn,),
        in_specs=[
            pl.BlockSpec((tn, d_pad), lambda i: (i, 0)),   # x rows stream
            full(packed["w1"].shape), full(packed["b1"].shape),
            full(packed["w2"].shape), full(packed["b2"].shape),
            full(packed["w3"].shape), full(packed["b3"].shape),
        ],
        out_specs=pl.BlockSpec((tn, out_pack), lambda i: (i, 0)),
        compiler_params=pltpu.CompilerParams(
            dimension_semantics=("parallel",)),   # shard rows across TCs (v7x)
    )(xp, packed["w1"], packed["b1"], packed["w2"], packed["b2"],
      packed["w3"], packed["b3"])

    out = out[:n]
    sl = lambda name: out[:, offs[name]:offs[name] + dims[name]]
    return {name: sl(name) for name in HEAD_NAMES}


# ----------------------------------------------------------------------------
# Pure-JAX f32 reference (semantics check against the torch module)
# ----------------------------------------------------------------------------

def reference_forward(heads, x):
    def mlp(hd):
        h = jnp.maximum(x @ hd["w1"] + hd["b1"], 0.0)
        h = jnp.maximum(h @ hd["w2"] + hd["b2"], 0.0)
        return h @ hd["w3"] + hd["b3"]

    return {
        "xyz": jnp.tanh(mlp(heads[0])) / 10.0,
        "rot": mlp(heads[1]),
        "color": 1.0 / (1.0 + jnp.exp(-mlp(heads[2]))),
        "scale": mlp(heads[3]),
        "opacity": mlp(heads[4]),
    }


# ----------------------------------------------------------------------------
# Demo
# ----------------------------------------------------------------------------

if __name__ == "__main__":
    key = jax.random.PRNGKey(0)
    k_param, k_x = jax.random.split(key)

    N = 64            # number of gaussians (small demo size)
    INPUT_DIM = 96    # per-gaussian feature dim
    HIDDEN_DIM = 64   # head hidden dim (second hidden = 32)
    COLOR_DIM = 3

    heads, out_dims = init_params(k_param, INPUT_DIM, HIDDEN_DIM, COLOR_DIM)
    packed, meta = pack_params(heads, out_dims, INPUT_DIM, HIDDEN_DIM)

    x = jax.random.normal(k_x, (N, INPUT_DIM), jnp.float32)

    fwd = jax.jit(lambda p, xx: gaussian_param_predictor_forward(p, meta, xx))
    out = fwd(packed, x)
    jax.block_until_ready(out)

    # sanity: shapes, finiteness, and agreement with the f32 reference
    # (loose tolerance: kernel matmuls use bf16 inputs with f32 accumulation)
    ref = reference_forward(heads, x)
    expect = {"xyz": 3, "rot": 4, "color": COLOR_DIM, "scale": 3, "opacity": 1}
    for name, dim in expect.items():
        assert out[name].shape == (N, dim), (name, out[name].shape)
        assert bool(jnp.all(jnp.isfinite(out[name]))), name
        err = float(jnp.max(jnp.abs(out[name] - ref[name])))
        assert err < 0.1, f"{name}: max abs err {err}"

    print("KERNEL_OK")
</pallas_src>

<mosaic_0001>
module attributes {stable_mosaic.version = 11 : i64} {
  func.func @_fused_heads_kernel(%arg0: i32, %arg1: memref<64x128xbf16, #tpu.memory_space<vmem>>, %arg2: memref<128x384xbf16, #tpu.memory_space<vmem>>, %arg3: memref<1x384xf32, #tpu.memory_space<vmem>>, %arg4: memref<384x256xbf16, #tpu.memory_space<vmem>>, %arg5: memref<1x256xf32, #tpu.memory_space<vmem>>, %arg6: memref<256x128xbf16, #tpu.memory_space<vmem>>, %arg7: memref<1x128xf32, #tpu.memory_space<vmem>>, %arg8: memref<64x128xf32, #tpu.memory_space<vmem>>) attributes {dimension_semantics = [#tpu.dimension_semantics<parallel>], iteration_bounds = array<i64: 1>, scalar_prefetch = 0 : i64, scratch_operands = 0 : i64, tpu.core_type = #tpu.core_type<tc>, window_params = [{transform_indices = @transform_0, window_bounds = array<i64: 64, 128>}, {pipeline_mode = #tpu.pipeline_mode<synchronous>, transform_indices = @transform_1, window_bounds = array<i64: 128, 384>}, {pipeline_mode = #tpu.pipeline_mode<synchronous>, transform_indices = @transform_2, window_bounds = array<i64: 1, 384>}, {pipeline_mode = #tpu.pipeline_mode<synchronous>, transform_indices = @transform_3, window_bounds = array<i64: 384, 256>}, {pipeline_mode = #tpu.pipeline_mode<synchronous>, transform_indices = @transform_4, window_bounds = array<i64: 1, 256>}, {pipeline_mode = #tpu.pipeline_mode<synchronous>, transform_indices = @transform_5, window_bounds = array<i64: 256, 128>}, {pipeline_mode = #tpu.pipeline_mode<synchronous>, transform_indices = @transform_6, window_bounds = array<i64: 1, 128>}, {transform_indices = @transform_7, window_bounds = array<i64: 64, 128>}]} {
    %c0 = arith.constant 0 : index
    %c0_0 = arith.constant 0 : index
    %0 = vector.load %arg1[%c0, %c0_0] : memref<64x128xbf16, #tpu.memory_space<vmem>>, vector<64x128xbf16>
    %c0_1 = arith.constant 0 : index
    %c0_2 = arith.constant 0 : index
    %1 = vector.load %arg2[%c0_1, %c0_2] : memref<128x384xbf16, #tpu.memory_space<vmem>>, vector<128x384xbf16>
    %cst = arith.constant dense<0.000000e+00> : vector<64x384xf32>
    %2 = tpu.matmul %0, %1, %cst {dimension_numbers = #tpu.dot_dimension_numbers<[1], [0], [0], [1], [0, 0, 1, 1], [], []>} : vector<64x128xbf16>, vector<128x384xbf16>, vector<64x384xf32> -> vector<64x384xf32>
    %c0_3 = arith.constant 0 : index
    %c0_4 = arith.constant 0 : index
    %3 = vector.load %arg3[%c0_3, %c0_4] : memref<1x384xf32, #tpu.memory_space<vmem>>, vector<1x384xf32>
    %4 = vector.broadcast %3 : vector<1x384xf32> to vector<64x384xf32>
    %5 = arith.addf %2, %4 : vector<64x384xf32>
    %cst_5 = arith.constant 0.000000e+00 : f32
    %6 = vector.broadcast %cst_5 : f32 to vector<64x384xf32>
    %7 = arith.maximumf %5, %6 : vector<64x384xf32>
    %8 = arith.truncf %7 : vector<64x384xf32> to vector<64x384xbf16>
    %c0_6 = arith.constant 0 : index
    %c0_7 = arith.constant 0 : index
    %9 = vector.load %arg4[%c0_6, %c0_7] : memref<384x256xbf16, #tpu.memory_space<vmem>>, vector<384x256xbf16>
    %cst_8 = arith.constant dense<0.000000e+00> : vector<64x256xf32>
    %10 = tpu.matmul %8, %9, %cst_8 {dimension_numbers = #tpu.dot_dimension_numbers<[1], [0], [0], [1], [0, 0, 1, 1], [], []>} : vector<64x384xbf16>, vector<384x256xbf16>, vector<64x256xf32> -> vector<64x256xf32>
    %c0_9 = arith.constant 0 : index
    %c0_10 = arith.constant 0 : index
    %11 = vector.load %arg5[%c0_9, %c0_10] : memref<1x256xf32, #tpu.memory_space<vmem>>, vector<1x256xf32>
    %12 = vector.broadcast %11 : vector<1x256xf32> to vector<64x256xf32>
    %13 = arith.addf %10, %12 : vector<64x256xf32>
    %cst_11 = arith.constant 0.000000e+00 : f32
    %14 = vector.broadcast %cst_11 : f32 to vector<64x256xf32>
    %15 = arith.maximumf %13, %14 : vector<64x256xf32>
    %16 = arith.truncf %15 : vector<64x256xf32> to vector<64x256xbf16>
    %c0_12 = arith.constant 0 : index
    %c0_13 = arith.constant 0 : index
    %17 = vector.load %arg6[%c0_12, %c0_13] : memref<256x128xbf16, #tpu.memory_space<vmem>>, vector<256x128xbf16>
    %cst_14 = arith.constant dense<0.000000e+00> : vector<64x128xf32>
    %18 = tpu.matmul %16, %17, %cst_14 {dimension_numbers = #tpu.dot_dimension_numbers<[1], [0], [0], [1], [0, 0, 1, 1], [], []>} : vector<64x256xbf16>, vector<256x128xbf16>, vector<64x128xf32> -> vector<64x128xf32>
    %c0_15 = arith.constant 0 : index
    %c0_16 = arith.constant 0 : index
    %19 = vector.load %arg7[%c0_15, %c0_16] : memref<1x128xf32, #tpu.memory_space<vmem>>, vector<1x128xf32>
    %20 = vector.broadcast %19 : vector<1x128xf32> to vector<64x128xf32>
    %21 = arith.addf %18, %20 : vector<64x128xf32>
    %22 = tpu.iota {dimensions = array<i32: 1>} : vector<64x128xi32>
    %23 = math.tanh %21 : vector<64x128xf32>
    %cst_17 = arith.constant 1.000000e-01 : f32
    %24 = vector.broadcast %cst_17 : f32 to vector<64x128xf32>
    %25 = arith.mulf %23, %24 : vector<64x128xf32>
    %cst_18 = arith.constant 0.000000e+00 : f32
    %26 = vector.broadcast %cst_18 : f32 to vector<64x128xf32>
    %27 = arith.subf %26, %21 : vector<64x128xf32>
    %28 = math.exp %27 : vector<64x128xf32>
    %cst_19 = arith.constant 1.000000e+00 : f32
    %29 = vector.broadcast %cst_19 : f32 to vector<64x128xf32>
    %30 = arith.addf %29, %28 : vector<64x128xf32>
    %cst_20 = arith.constant 1.000000e+00 : f32
    %31 = vector.broadcast %cst_20 : f32 to vector<64x128xf32>
    %32 = arith.divf %31, %30 : vector<64x128xf32>
    %c3_i32 = arith.constant 3 : i32
    %33 = vector.broadcast %c3_i32 : i32 to vector<64x128xi32>
    %34 = arith.cmpi slt, %22, %33 : vector<64x128xi32>
    %c7_i32 = arith.constant 7 : i32
    %35 = vector.broadcast %c7_i32 : i32 to vector<64x128xi32>
    %36 = arith.cmpi sge, %22, %35 : vector<64x128xi32>
    %c10_i32 = arith.constant 10 : i32
    %37 = vector.broadcast %c10_i32 : i32 to vector<64x128xi32>
    %38 = arith.cmpi slt, %22, %37 : vector<64x128xi32>
    %39 = arith.andi %36, %38 : vector<64x128xi1>
    %40 = arith.select %39, %32, %21 : vector<64x128xi1>, vector<64x128xf32>
    %41 = arith.select %34, %25, %40 : vector<64x128xi1>, vector<64x128xf32>
    %c0_21 = arith.constant 0 : index
    %c0_22 = arith.constant 0 : index
    %42 = vector.load %arg8[%c0_21, %c0_22] : memref<64x128xf32, #tpu.memory_space<vmem>>, vector<64x128xf32>
    tpu.vector_store %arg8[%c0_21, %c0_22], %41 {strides = array<i32>} : memref<64x128xf32, #tpu.memory_space<vmem>>, vector<64x128xf32>,
    return
  }
  func.func @transform_0(%arg0: i32) -> (i32, i32) {
    %c0_i32 = arith.constant 0 : i32
    %c0_i32_0 = arith.constant 0 : i32
    return %arg0, %c0_i32 : i32, i32
  }
  func.func @transform_1(%arg0: i32) -> (i32, i32) {
    %c0_i32 = arith.constant 0 : i32
    %c0_i32_0 = arith.constant 0 : i32
    %c0_i32_1 = arith.constant 0 : i32
    return %c0_i32, %c0_i32_0 : i32, i32
  }
  func.func @transform_2(%arg0: i32) -> (i32, i32) {
    %c0_i32 = arith.constant 0 : i32
    %c0_i32_0 = arith.constant 0 : i32
    %c0_i32_1 = arith.constant 0 : i32
    return %c0_i32, %c0_i32_0 : i32, i32
  }
  func.func @transform_3(%arg0: i32) -> (i32, i32) {
    %c0_i32 = arith.constant 0 : i32
    %c0_i32_0 = arith.constant 0 : i32
    %c0_i32_1 = arith.constant 0 : i32
    return %c0_i32, %c0_i32_0 : i32, i32
  }
  func.func @transform_4(%arg0: i32) -> (i32, i32) {
    %c0_i32 = arith.constant 0 : i32
    %c0_i32_0 = arith.constant 0 : i32
    %c0_i32_1 = arith.constant 0 : i32
    return %c0_i32, %c0_i32_0 : i32, i32
  }
  func.func @transform_5(%arg0: i32) -> (i32, i32) {
    %c0_i32 = arith.constant 0 : i32
    %c0_i32_0 = arith.constant 0 : i32
    %c0_i32_1 = arith.constant 0 : i32
    return %c0_i32, %c0_i32_0 : i32, i32
  }
  func.func @transform_6(%arg0: i32) -> (i32, i32) {
    %c0_i32 = arith.constant 0 : i32
    %c0_i32_0 = arith.constant 0 : i32
    %c0_i32_1 = arith.constant 0 : i32
    return %c0_i32, %c0_i32_0 : i32, i32
  }
  func.func @transform_7(%arg0: i32) -> (i32, i32) {
    %c0_i32 = arith.constant 0 : i32
    %c0_i32_0 = arith.constant 0 : i32
    return %arg0, %c0_i32 : i32, i32
  }
}

</mosaic_0001>

<bundles_post_ra>
// kernel: _lambda_.1
= control target key start
LH: loop header
LB: loop body
LE: loop exit
PB: predicated region body
PF: predicated region fallthrough
CT: control target
= control target key end

     0   :  { %12 = vsyncpa [#allocation3], 0  ;;  %s2174_s0 = inlined_call_operand.vmem [shape: bf16[64,128], index: 0, kind: input, shape index: {}]   ;;  %s2175_s1 = inlined_call_operand.hbm [shape: bf16[128,384], index: 1, kind: input, shape index: {}]   ;;  %s2176_s2 = inlined_call_operand.vmem [shape: f32[1,384], index: 2, kind: input, shape index: {}]   ;;  %s2177_s3 = inlined_call_operand.hbm [shape: bf16[384,256], index: 3, kind: input, shape index: {}]   ;;  %s2178_s4 = inlined_call_operand.vmem [shape: f32[1,256], index: 4, kind: input, shape index: {}]   ;;  %s2179_s5 = inlined_call_operand.vmem [shape: bf16[256,128], index: 5, kind: input, shape index: {}]   ;;  %s2180_s6 = inlined_call_operand.vmem [shape: f32[1,128], index: 6, kind: input, shape index: {}]   ;;  %s2181_s7 = inlined_call_operand.vmem [shape: f32[64,128], index: 7, kind: output, shape index: {}]  }
   0x1   :  { %s20_s26 = sshll.u32 %s2175_s1, 4  ;;  %s21_s26 = int_to_ptr.hbm [resolvable:$true] %s20_s26 }
   0x2   :  { %13 = vsyncpa [#allocation5], 0  ;;  %s1858_s27 = smov [#allocation2]   ;;  %s35_s8 = sshll.u32 %s2177_s3, 4  ;;  %s36_s8 = int_to_ptr.hbm [resolvable:$true] %s35_s8 }
   0x3   :  { %s22_s28 = sshll.u32 %s1858_s27, 4  ;;  %s1859_s9 = smov 192   ;;  %s23_s28 = int_to_ptr.vmem [resolvable:$true] %s22_s28 }
   0x4   :  { %s1860_s10 = smov 12   ;;  %s1861_s11 = smov [#allocation4]  }
   0x5   :  { %28 = dma.hbm_to_vmem [thread:$0]  %s21_s26, 3072, %s23_s28, [#allocation3], %s1859_s9, %s1859_s9, %s1860_s10  }
   0x6   :  { %s37_s12 = sshll.u32 %s1861_s11, 4  ;;  %s1862_s13 = smov 128   ;;  %s38_s12 = int_to_ptr.vmem [resolvable:$true] %s37_s12 }
   0x7   :  { %s1863_s14 = smov 8  }
   0x8   :  { %43 = dma.hbm_to_vmem [thread:$0]  %s36_s8, 6144, %s38_s12, [#allocation5], %s1862_s13, %s1862_s13, %s1863_s14  }
   0x9   :  { %1854 = dma.done.wait [#allocation3], 3072  }
   0xa   :  { %1855 = vsyncadd [#allocation3], 4294964224 }
   0xb   :  { %1856 = dma.done.wait [#allocation5], 6144  }
   0xc   :  { %1857 = vsyncadd [#allocation5], 4294961152  ;;  %v1369_v0 = vld [vmem:[#allocation2 + $0xa8] sm:$0xf]  ;;  %v1661_v1 = vld [vmem:[#allocation2 + $0xb0] sm:$0xf0] }
   0xd   :  { %v1660_v2 = vld [vmem:[#allocation2 + $0xac] sm:$0xf]  ;;  %v1370_v3 = vor.u32 %v1661_v1, %v1369_v0  ;;  %v1371_v4 = vld [vmem:[#allocation2 + $0xb4] sm:$0xf0]  ;;  %v1357_v5 = vld [vmem:[#allocation2 + $0x90] sm:$0xf] }
   0xe   :  { %v1658_v6 = vld [vmem:[#allocation2 + $0x98] sm:$0xf0]  ;;  %v1374_v7 = vor.u32 %v1660_v2, %v1371_v4  ;;  %v1657_v8 = vld [vmem:[#allocation2 + $0x94] sm:$0xf]  ;;  %v1359_v9 = vld [vmem:[#allocation2 + $0x9c] sm:$0xf0] }
   0xf   :  { %v1377_v10 = vld [vmem:[#allocation2 + $0xb0] sm:$0xf]  ;;  %258 = vmatpush.bf16.msra.mxu0 %v1370_v3  ;;  %v1358_v11 = vor.u32 %v1658_v6, %v1357_v5  ;;  %v1662_v12 = vld [vmem:[#allocation2 + $0xb8] sm:$0xf0]  ;;  %1727 = vmatpush.bf16.msra.mxu3 %v1370_v3  ;;  %v1362_v13 = vor.u32 %v1657_v8, %v1359_v9  ;;  %v1345_v15 = vld [vmem:[#allocation2 + $0x78] sm:$0xf] }
  0x10   :  { %287 = vmatpush.bf16.msra.mxu1 %v1374_v7  ;;  %v1378_v14 = vor.u32 %v1662_v12, %v1377_v10  ;;  %v1655_v16 = vld [vmem:[#allocation2 + $0x80] sm:$0xf0]  ;;  %v1365_v17 = vld [vmem:[#allocation2 + $0x98] sm:$0xf]  ;;  %v1654_v18 = vld [vmem:[#allocation2 + $0x7c] sm:$0xf] }
  0x11   :  { %v1347_v19 = vld [vmem:[#allocation2 + $0x84] sm:$0xf0]  ;;  %v1659_v20 = vld [vmem:[#allocation2 + $0xa0] sm:$0xf0]  ;;  %v1346_v22 = vor.u32 %v1655_v16, %v1345_v15  ;;  %v1353_v23 = vld [vmem:[#allocation2 + $0x80] sm:$0xf] }
  0x12   :  { %316 = vmatpush.bf16.msra.mxu2 %v1378_v14  ;;  %v1366_v21 = vor.u32 %v1659_v20, %v1365_v17  ;;  %v1656_v24 = vld [vmem:[#allocation2 + $0x88] sm:$0xf0]  ;;  %v1350_v25 = vor.u32 %v1654_v18, %v1347_v19  ;;  %v1333_v26 = vld [vmem:[#allocation2 + $0x60] sm:$0xf]  ;;  %v1651_v28 = vld [vmem:[#allocation2 + $0x64] sm:$0xf] }
  0x13   :  { %259 = vmatpush.bf16.msra.mxu0 %v1358_v11  ;;  %1728 = vmatpush.bf16.msra.mxu3 %v1358_v11  ;;  %v1652_v27 = vld [vmem:[#allocation2 + $0x68] sm:$0xf0]  ;;  %v1335_v29 = vld [vmem:[#allocation2 + $0x6c] sm:$0xf0]  ;;  %v1354_v30 = vor.u32 %v1656_v24, %v1353_v23  ;;  %v1341_v32 = vld [vmem:[#allocation2 + $0x68] sm:$0xf] }
  0x14   :  { %288 = vmatpush.bf16.msra.mxu1 %v1362_v13  ;;  %v1334_v31 = vor.u32 %v1652_v27, %v1333_v26  ;;  %v1653_v33 = vld [vmem:[#allocation2 + $0x70] sm:$0xf0]  ;;  %v1338_v34 = vor.u32 %v1651_v28, %v1335_v29  ;;  %v1321_v35 = vld [vmem:[#allocation2 + $0x48] sm:$0xf]  ;;  %v1648_v37 = vld [vmem:[#allocation2 + $0x4c] sm:$0xf] }
  0x15   :  { %v1649_v36 = vld [vmem:[#allocation2 + $0x50] sm:$0xf0]  ;;  %v1323_v38 = vld [vmem:[#allocation2 + $0x54] sm:$0xf0]  ;;  %v1342_v39 = vor.u32 %v1653_v33, %v1341_v32  ;;  %v1329_v41 = vld [vmem:[#allocation2 + $0x50] sm:$0xf] }
  0x16   :  { %317 = vmatpush.bf16.msra.mxu2 %v1366_v21  ;;  %v1322_v40 = vor.u32 %v1649_v36, %v1321_v35  ;;  %v1650_v42 = vld [vmem:[#allocation2 + $0x58] sm:$0xf0]  ;;  %v1326_v43 = vor.u32 %v1648_v37, %v1323_v38  ;;  %v1309_v44 = vld [vmem:[#allocation2 + $0x30] sm:$0xf]  ;;  %v1645_v46 = vld [vmem:[#allocation2 + $0x34] sm:$0xf] }
  0x17   :  { %260 = vmatpush.bf16.msra.mxu0 %v1346_v22  ;;  %1729 = vmatpush.bf16.msra.mxu3 %v1346_v22  ;;  %v1646_v45 = vld [vmem:[#allocation2 + $0x38] sm:$0xf0]  ;;  %v1311_v47 = vld [vmem:[#allocation2 + $0x3c] sm:$0xf0]  ;;  %v1330_v48 = vor.u32 %v1650_v42, %v1329_v41  ;;  %v1317_v50 = vld [vmem:[#allocation2 + $0x38] sm:$0xf] }
  0x18   :  { %289 = vmatpush.bf16.msra.mxu1 %v1350_v25  ;;  %v1310_v49 = vor.u32 %v1646_v45, %v1309_v44  ;;  %v1647_v51 = vld [vmem:[#allocation2 + $0x40] sm:$0xf0]  ;;  %v1314_v52 = vor.u32 %v1645_v46, %v1311_v47  ;;  %v1297_v53 = vld [vmem:[#allocation2 + $0x18] sm:$0xf]  ;;  %v1642_v55 = vld [vmem:[#allocation2 + $0x1c] sm:$0xf] }
  0x19   :  { %v1643_v54 = vld [vmem:[#allocation2 + $0x20] sm:$0xf0]  ;;  %v1299_v56 = vld [vmem:[#allocation2 + $0x24] sm:$0xf0]  ;;  %v1318_v57 = vor.u32 %v1647_v51, %v1317_v50  ;;  %v1305_v59 = vld [vmem:[#allocation2 + $0x20] sm:$0xf] }
  0x1a   :  { %318 = vmatpush.bf16.msra.mxu2 %v1354_v30  ;;  %v1298_v58 = vor.u32 %v1643_v54, %v1297_v53  ;;  %v1644_v60 = vld [vmem:[#allocation2 + $0x28] sm:$0xf0]  ;;  %v1302_v61 = vor.u32 %v1642_v55, %v1299_v56  ;;  %v1285_v62 = vld [vmem:[#allocation2] sm:$0xf]  ;;  %v1639_v0 = vld [vmem:[#allocation2 + $0x4] sm:$0xf] }
  0x1b   :  { %261 = vmatpush.bf16.msra.mxu0 %v1334_v31  ;;  %1730 = vmatpush.bf16.msra.mxu3 %v1334_v31  ;;  %v1640_v63 = vld [vmem:[#allocation2 + $0x8] sm:$0xf0]  ;;  %v1287_v1 = vld [vmem:[#allocation2 + $0xc] sm:$0xf0]  ;;  %v1306_v2 = vor.u32 %v1644_v60, %v1305_v59  ;;  %v1293_v4 = vld [vmem:[#allocation2 + $0x8] sm:$0xf] }
  0x1c   :  { %290 = vmatpush.bf16.msra.mxu1 %v1338_v34  ;;  %v1286_v3 = vor.u32 %v1640_v63, %v1285_v62  ;;  %v1641_v5 = vld [vmem:[#allocation2 + $0x10] sm:$0xf0]  ;;  %v1290_v6 = vor.u32 %v1639_v0, %v1287_v1  ;;  %v1635_v7 = vld [vmem:[%s2174_s0] sm:$0xff]  ;;  %v1636_v10 = vld [vmem:[%s2174_s0 + $0x8] sm:$0xff] }
  0x1d   :  { %v1294_v8 = vor.u32 %v1641_v5, %v1293_v4  ;;  %v1916_v9 = vld [vmem:[%s2174_s0 + $0x10] sm:$0xff]  ;;  %v1925_v11 = vld [vmem:[%s2174_s0 + $0x18] sm:$0xff]  ;;  %v1429_v21 = vld [vmem:[#allocation4 + $0x60] sm:$0xf] }
  0x1e   :  { %319 = vmatpush.bf16.msra.mxu2 %v1342_v39  ;;  %v1437_v12 = vld [vmem:[#allocation4 + $0x70] sm:$0xf]  ;;  %v1678_v13 = vld [vmem:[#allocation4 + $0x74] sm:$0xf0]  ;;  %v1677_v17 = vld [vmem:[#allocation4 + $0x74] sm:$0xf] }
  0x1f   :  { %262 = vmatpush.bf16.msra.mxu0 %v1322_v40  ;;  %1731 = vmatpush.bf16.msra.mxu3 %v1322_v40  ;;  %v1501_v14 = vld [vmem:[#allocation4 + $0xf0] sm:$0xf]  ;;  %v1438_v15 = vor.u32 %v1678_v13, %v1437_v12  ;;  %v1694_v16 = vld [vmem:[#allocation4 + $0xf4] sm:$0xf0]  ;;  %v1439_v18 = vld [vmem:[#allocation4 + $0x78] sm:$0xf0] }
  0x20   :  { %291 = vmatpush.bf16.msra.mxu1 %v1326_v43  ;;  %v1502_v19 = vor.u32 %v1694_v16, %v1501_v14  ;;  %v1442_v20 = vor.u32 %v1677_v17, %v1439_v18  ;;  %v1676_v22 = vld [vmem:[#allocation4 + $0x64] sm:$0xf0]  ;;  %v1493_v23 = vld [vmem:[#allocation4 + $0xe0] sm:$0xf]  ;;  %v1675_v26 = vld [vmem:[#allocation4 + $0x64] sm:$0xf] }
  0x21   :  { %v1430_v24 = vor.u32 %v1676_v22, %v1429_v21  ;;  %v1692_v25 = vld [vmem:[#allocation4 + $0xe4] sm:$0xf0]  ;;  %v1431_v27 = vld [vmem:[#allocation4 + $0x68] sm:$0xf0]  ;;  %v1421_v30 = vld [vmem:[#allocation4 + $0x50] sm:$0xf] }
  0x22   :  { %320 = vmatpush.bf16.msra.mxu2 %v1330_v48  ;;  %v1494_v28 = vor.u32 %v1692_v25, %v1493_v23  ;;  %v1434_v29 = vor.u32 %v1675_v26, %v1431_v27  ;;  %v1674_v31 = vld [vmem:[#allocation4 + $0x54] sm:$0xf0]  ;;  %v1485_v32 = vld [vmem:[#allocation4 + $0xd0] sm:$0xf]  ;;  %v1673_v34 = vld [vmem:[#allocation4 + $0x54] sm:$0xf] }
  0x23   :  { %263 = vmatpush.bf16.msra.mxu0 %v1310_v49  ;;  %1732 = vmatpush.bf16.msra.mxu3 %v1310_v49  ;;  %v1690_v33 = vld [vmem:[#allocation4 + $0xd4] sm:$0xf0]  ;;  %v1423_v35 = vld [vmem:[#allocation4 + $0x58] sm:$0xf0]  ;;  %v1565_v36 = vld [vmem:[#allocation4 + $0x170] sm:$0xf]  ;;  %v1422_v38 = vor.u32 %v1674_v31, %v1421_v30 }
  0x24   :  { %292 = vmatpush.bf16.msra.mxu1 %v1314_v52  ;;  %v1710_v37 = vld [vmem:[#allocation4 + $0x174] sm:$0xf0]  ;;  %v1486_v40 = vor.u32 %v1690_v33, %v1485_v32  ;;  %v1426_v41 = vor.u32 %v1673_v34, %v1423_v35  ;;  %v1413_v42 = vld [vmem:[#allocation4 + $0x40] sm:$0xf]  ;;  %v1672_v43 = vld [vmem:[#allocation4 + $0x44] sm:$0xf0] }
  0x25   :  { %v1566_v39 = vor.u32 %v1710_v37, %v1565_v36  ;;  %v1557_v44 = vld [vmem:[#allocation4 + $0x160] sm:$0xf]  ;;  %v1688_v46 = vld [vmem:[#allocation4 + $0xc4] sm:$0xf0]  ;;  %v1671_v48 = vld [vmem:[#allocation4 + $0x44] sm:$0xf]  ;;  %v1414_v51 = vor.u32 %v1672_v43, %v1413_v42 }
  0x26   :  { %321 = vmatpush.bf16.msra.mxu2 %v1318_v57  ;;  %v1477_v45 = vld [vmem:[#allocation4 + $0xc0] sm:$0xf]  ;;  %v1708_v47 = vld [vmem:[#allocation4 + $0x164] sm:$0xf0]  ;;  %v1415_v49 = vld [vmem:[#allocation4 + $0x48] sm:$0xf0] }
  0x27   :  { %264 = vmatpush.bf16.msra.mxu0 %v1298_v58  ;;  %1733 = vmatpush.bf16.msra.mxu3 %v1298_v58  ;;  %v1558_v50 = vor.u32 %v1708_v47, %v1557_v44  ;;  %v1478_v52 = vor.u32 %v1688_v46, %v1477_v45  ;;  %v1405_v53 = vld [vmem:[#allocation4 + $0x30] sm:$0xf]  ;;  %v1670_v54 = vld [vmem:[#allocation4 + $0x34] sm:$0xf0]  ;;  %v1418_v55 = vor.u32 %v1671_v48, %v1415_v49  ;;  %v1669_v59 = vld [vmem:[#allocation4 + $0x34] sm:$0xf] }
  0x28   :  { %293 = vmatpush.bf16.msra.mxu1 %v1302_v61  ;;  %v1406_v56 = vor.u32 %v1670_v54, %v1405_v53  ;;  %v1469_v57 = vld [vmem:[#allocation4 + $0xb0] sm:$0xf]  ;;  %v1686_v58 = vld [vmem:[#allocation4 + $0xb4] sm:$0xf0]  ;;  %v1407_v61 = vld [vmem:[#allocation4 + $0x38] sm:$0xf0] }
  0x29   :  { %v1470_v60 = vor.u32 %v1686_v58, %v1469_v57  ;;  %v1410_v62 = vor.u32 %v1669_v59, %v1407_v61  ;;  %v1549_v63 = vld [vmem:[#allocation4 + $0x150] sm:$0xf]  ;;  %v1706_v0 = vld [vmem:[#allocation4 + $0x154] sm:$0xf0]  ;;  %v1461_v4 = vld [vmem:[#allocation4 + $0xa0] sm:$0xf] }
  0x2a   :  { %322 = vmatpush.bf16.msra.mxu2 %v1306_v2  ;;  %v1550_v1 = vor.u32 %v1706_v0, %v1549_v63  ;;  %v1397_v2 = vld [vmem:[#allocation4 + $0x20] sm:$0xf]  ;;  %v1389_v14 = vld [vmem:[#allocation4 + $0x10] sm:$0xf]  ;;  %v1682_v18 = vld [vmem:[#allocation4 + $0x94] sm:$0xf0] }
  0x2b   :  { %265 = vmatpush.bf16.msra.mxu0 %v1286_v3  ;;  %1734 = vmatpush.bf16.msra.mxu3 %v1286_v3  ;;  %v1668_v3 = vld [vmem:[#allocation4 + $0x24] sm:$0xf0]  ;;  %v1453_v17 = vld [vmem:[#allocation4 + $0x90] sm:$0xf]  ;;  %v1391_v21 = vld [vmem:[#allocation4 + $0x18] sm:$0xf0] }
  0x2c   :  { %294 = vmatpush.bf16.msra.mxu1 %v1290_v6  ;;  %v1398_v5 = vor.u32 %v1668_v3, %v1397_v2  ;;  %v1684_v6 = vld [vmem:[#allocation4 + $0xa4] sm:$0xf0]  ;;  %v1533_v23 = vld [vmem:[#allocation4 + $0x130] sm:$0xf]  ;;  %v1381_v26 = vld [vmem:[#allocation4] sm:$0xf] }
  0x2d   :  { %v1664_v27 = vld [vmem:[#allocation4 + $0x4] sm:$0xf0]  ;;  %v1663_v31 = vld [vmem:[#allocation4 + $0x4] sm:$0xf]  ;;  %v1383_v32 = vld [vmem:[#allocation4 + $0x8] sm:$0xf0] }
  0x2e   :  { %266 = vmatmul.bf16.vlgmr.msra.gmra.mxu0 %v1635_v7  ;;  %323 = vmatpush.bf16.msra.mxu2 %v1294_v8  ;;  %v1462_v8 = vor.u32 %v1684_v6, %v1461_v4  ;;  %v1680_v30 = vld [vmem:[#allocation4 + $0x84] sm:$0xf0]  ;;  %v1386_v34 = vor.u32 %v1663_v31, %v1383_v32  ;;  %v1525_v35 = vld [vmem:[#allocation4 + $0x120] sm:$0xf]  ;;  %v1698_v42 = vld [vmem:[#allocation4 + $0x114] sm:$0xf0] }
  0x2f   :  { %295 = vmatmul.bf16.vlgmr.msra.gmra.mxu1 %v1635_v7  ;;  %276 = vmatmul.bf16.vlgmr.msra.gmra.mxu3 %v1916_v9  ;;  %v1700_v36 = vld [vmem:[#allocation4 + $0x124] sm:$0xf0]  ;;  %v1509_v44 = vld [vmem:[#allocation4 + $0x100] sm:$0xf]  ;;  %v1691_v47 = vld [vmem:[#allocation4 + $0xe4] sm:$0xf] }
  0x30   :  { %675 = vmatpush.bf16.msrb.mxu3 %v1438_v15  ;;  %704 = vmatpush.bf16.msrb.mxu0 %v1502_v19  ;;  %v1666_v15 = vld [vmem:[#allocation4 + $0x14] sm:$0xf0]  ;;  %v1665_v19 = vld [vmem:[#allocation4 + $0x14] sm:$0xf]  ;;  %v1526_v37 = vor.u32 %v1700_v36, %v1525_v35  ;;  %v1696_v45 = vld [vmem:[#allocation4 + $0x104] sm:$0xf0] }
  0x31   :  { %324 = vmatmul.bf16.vlgmr.msra.gmra.mxu2 %v1635_v7  ;;  %733 = vmatpush.bf16.msrb.mxu1 %v1566_v39  ;;  %v1667_v7 = vld [vmem:[#allocation4 + $0x24] sm:$0xf]  ;;  %v1390_v16 = vor.u32 %v1666_v15, %v1389_v14  ;;  %v1394_v22 = vor.u32 %v1665_v19, %v1391_v21  ;;  %v1503_v39 = vld [vmem:[#allocation4 + $0xf8] sm:$0xf0]  ;;  %v1510_v46 = vor.u32 %v1696_v45, %v1509_v44  ;;  %v1495_v48 = vld [vmem:[#allocation4 + $0xe8] sm:$0xf0] }
  0x32   :  { %762 = vmatpush.bf16.msrb.mxu2 %v1442_v20  ;;  %v1454_v20 = vor.u32 %v1682_v18, %v1453_v17  ;;  %v1709_v49 = vld [vmem:[#allocation4 + $0x174] sm:$0xf]  ;;  %v98_v53 = vld [vmem:[%s2176_s2] sm:$0x7]  ;;  %v1707_v57 = vld [vmem:[#allocation4 + $0x164] sm:$0xf] }
  0x33   :  { %v1935_v61 = vperm.slane %v98_v53, 1  ;;  %v1937_v63 = vperm.slane %v98_v53, 0  ;;  %v1687_v0 = vld [vmem:[#allocation4 + $0xc4] sm:$0xf]  ;;  %v1705_v3 = vld [vmem:[#allocation4 + $0x154] sm:$0xf] }
  0x34   :  { %676 = vmatpush.bf16.msrb.mxu3 %v1430_v24  ;;  %705 = vmatpush.bf16.msrb.mxu0 %v1494_v28  ;;  %v1702_v24 = vld [vmem:[#allocation4 + $0x134] sm:$0xf0]  ;;  %v1445_v28 = vld [vmem:[#allocation4 + $0x80] sm:$0xf]  ;;  %v1551_v4 = vld [vmem:[#allocation4 + $0x158] sm:$0xf0] }
  0x35   :  { %734 = vmatpush.bf16.msrb.mxu1 %v1558_v50  ;;  %v1534_v25 = vor.u32 %v1702_v24, %v1533_v23  ;;  %v1446_v33 = vor.u32 %v1680_v30, %v1445_v28  ;;  %v1498_v50 = vor.u32 %v1691_v47, %v1495_v48  ;;  %v1554_v6 = vor.u32 %v1705_v3, %v1551_v4  ;;  %v1471_v23 = vld [vmem:[#allocation4 + $0xb8] sm:$0xf0]  ;;  %v1703_v24 = vld [vmem:[#allocation4 + $0x144] sm:$0xf]  ;;  %v1543_v28 = vld [vmem:[#allocation4 + $0x148] sm:$0xf0] }
  0x36   :  { %763 = vmatpush.bf16.msrb.mxu2 %v1434_v29  ;;  %v1382_v29 = vor.u32 %v1664_v27, %v1381_v26  ;;  %v1943_v14 = vperm.slane %v98_v53, 2  ;;  %v1546_v31 = vor.u32 %v1703_v24, %v1543_v28  ;;  %v1463_v35 = vld [vmem:[#allocation4 + $0xa8] sm:$0xf0] }
  0x38   :  { %677 = vmatpush.bf16.msrb.mxu3 %v1422_v38  ;;  %706 = vmatpush.bf16.msrb.mxu0 %v1486_v40  ;;  %v1693_v38 = vld [vmem:[#allocation4 + $0xf4] sm:$0xf]  ;;  %v1517_v40 = vld [vmem:[#allocation4 + $0x110] sm:$0xf] }
  0x39   :  { %735 = vmatpush.bf16.msrb.mxu1 %v1550_v1  ;;  %v1518_v43 = vor.u32 %v1698_v42, %v1517_v40  ;;  %v1479_v1 = vld [vmem:[#allocation4 + $0xc8] sm:$0xf0] }
  0x3a   :  { %764 = vmatpush.bf16.msrb.mxu2 %v1426_v41  ;;  %v1506_v41 = vor.u32 %v1693_v38, %v1503_v39  ;;  %v1482_v2 = vor.u32 %v1687_v0, %v1479_v1  ;;  %v1535_v38 = vld [vmem:[#allocation4 + $0x138] sm:$0xf0]  ;;  %v1527_v0 = vld [vmem:[#allocation4 + $0x128] sm:$0xf0] }
  0x3c   :  { %678 = vmatpush.bf16.msrb.mxu3 %v1414_v51  ;;  %707 = vmatpush.bf16.msrb.mxu0 %v1478_v52  ;;  %v1567_v51 = vld [vmem:[#allocation4 + $0x178] sm:$0xf0] }
  0x3d   :  { %v1570_v52 = vor.u32 %v1709_v49, %v1567_v51 }
  0x3e   :  { %271 = vmatmul.bf16.gmra.mxu0 %v1636_v10  ;;  %765 = vmatpush.bf16.msrb.mxu2 %v1418_v55  ;;  %v1689_v55 = vld [vmem:[#allocation4 + $0xd4] sm:$0xf] }
  0x3f   :  { %300 = vmatmul.bf16.gmra.mxu1 %v1636_v10  ;;  %281 = vmatmul.bf16.gmra.mxu3 %v1925_v11 }
  0x40   :  { %679 = vmatpush.bf16.msrb.mxu3 %v1406_v56  ;;  %708 = vmatpush.bf16.msrb.mxu0 %v1470_v60  ;;  %v1487_v56 = vld [vmem:[#allocation4 + $0xd8] sm:$0xf0]  ;;  %v1559_v60 = vld [vmem:[#allocation4 + $0x168] sm:$0xf0] }
  0x41   :  { %329 = vmatmul.bf16.gmra.mxu2 %v1636_v10  ;;  %v1541_v10 = vld [vmem:[#allocation4 + $0x140] sm:$0xf]  ;;  %v1490_v59 = vor.u32 %v1689_v55, %v1487_v56  ;;  %v1681_v56 = vld [vmem:[#allocation4 + $0x94] sm:$0xf] }
  0x42   :  { %766 = vmatpush.bf16.msrb.mxu2 %v1410_v62  ;;  %v1562_v62 = vor.u32 %v1707_v57, %v1559_v60  ;;  %v1455_v57 = vld [vmem:[#allocation4 + $0x98] sm:$0xf0] }
  0x44   :  { %680 = vmatpush.bf16.msrb.mxu3 %v1398_v5  ;;  %709 = vmatpush.bf16.msrb.mxu0 %v1462_v8 }
  0x48   :  { %681 = vmatpush.bf16.msrb.mxu3 %v1390_v16  ;;  %710 = vmatpush.bf16.msrb.mxu0 %v1454_v20 }
  0x4c   :  { %682 = vmatpush.bf16.msrb.mxu3 %v1382_v29  ;;  %711 = vmatpush.bf16.msrb.mxu0 %v1446_v33 }
  0x4f   :  { %305 = vmatmul.bf16.gmra.mxu1 %v1916_v9 }
  0x50   :  { %791 = vmatpush.bf16.msra.mxu3 %v1506_v41  ;;  %820 = vmatpush.bf16.msra.mxu0 %v1570_v52 }
  0x51   :  { %334 = vmatmul.bf16.gmra.mxu2 %v1916_v9  ;;  %v1399_v9 = vld [vmem:[#allocation4 + $0x28] sm:$0xf0] }
  0x52   :  { %v1402_v12 = vor.u32 %v1667_v7, %v1399_v9 }
  0x54   :  { %767 = vmatpush.bf16.msrb.mxu2 %v1402_v12  ;;  %792 = vmatpush.bf16.msra.mxu3 %v1498_v50 }
  0x55   :  { %821 = vmatpush.bf16.msra.mxu0 %v1562_v62  ;;  %v1458_v62 = vor.u32 %v1681_v56, %v1455_v57  ;;  %v1717_v57 = vld [vmem:[%s2179_s5 + $0x30] sm:$0xff] }
  0x58   :  { %768 = vmatpush.bf16.msrb.mxu2 %v1394_v22  ;;  %793 = vmatpush.bf16.msra.mxu3 %v1490_v59  ;;  %v1685_v22 = vld [vmem:[#allocation4 + $0xb4] sm:$0xf] }
  0x59   :  { %822 = vmatpush.bf16.msra.mxu0 %v1554_v6  ;;  %v1474_v27 = vor.u32 %v1685_v22, %v1471_v23  ;;  %v1447_v6 = vld [vmem:[#allocation4 + $0x88] sm:$0xf0] }
  0x5c   :  { %769 = vmatpush.bf16.msrb.mxu2 %v1386_v34  ;;  %794 = vmatpush.bf16.msra.mxu3 %v1482_v2  ;;  %v1683_v34 = vld [vmem:[#allocation4 + $0xa4] sm:$0xf] }
  0x5d   :  { %823 = vmatpush.bf16.msra.mxu0 %v1546_v31  ;;  %v1466_v36 = vor.u32 %v1683_v34, %v1463_v35 }
  0x5f   :  { %310 = vmatmul.bf16.gmra.mxu1 %v1925_v11 }
  0x60   :  { %795 = vmatpush.bf16.msra.mxu3 %v1474_v27 }
  0x61   :  { %339 = vmatmul.bf16.gmra.mxu2 %v1925_v11  ;;  %v1704_v11 = vld [vmem:[#allocation4 + $0x144] sm:$0xf0] }
  0x62   :  { %v1542_v13 = vor.u32 %v1704_v11, %v1541_v10 }
  0x64   :  { %736 = vmatpush.bf16.msrb.mxu1 %v1542_v13  ;;  %796 = vmatpush.bf16.msra.mxu3 %v1466_v36 }
  0x68   :  { %737 = vmatpush.bf16.msrb.mxu1 %v1534_v25  ;;  %797 = vmatpush.bf16.msra.mxu3 %v1458_v62  ;;  %v2004_v62 = vld [vmem:[%s2178_s4] sm:$0x3] }
  0x6c   :  { %738 = vmatpush.bf16.msrb.mxu1 %v1526_v37  ;;  %v1701_v37 = vld [vmem:[#allocation4 + $0x134] sm:$0xf] }
  0x6d   :  { %v1538_v41 = vor.u32 %v1701_v37, %v1535_v38 }
  0x6f   :  { %824 = vmatpush.bf16.msra.mxu0 %v1538_v41 }
  0x70   :  { %739 = vmatpush.bf16.msrb.mxu1 %v1518_v43 }
  0x74   :  { %740 = vmatpush.bf16.msrb.mxu1 %v1510_v46 }
  0xab   :  { %v267_v54 = vpop.f32.mrf.mxu0 }
  0xac   :  { %v296_v58 = vpop.f32.mrf.mxu1  ;;  %v268_v7 = vadd.f32 %v267_v54, %v1937_v63 }
  0xad   :  { %v297_v5 = vadd.f32 %v296_v58, %v1935_v61  ;;  %v1699_v58 = vld [vmem:[#allocation4 + $0x124] sm:$0xf] }
  0xae   :  { %v345_v15 = vmax.f32 %v268_v7, 0.0  ;;  %v1530_v3 = vor.u32 %v1699_v58, %v1527_v0  ;;  %v1712_v58 = vld [vmem:[%s2179_s5 + $0x8] sm:$0xff]  ;;  %v2007_v0 = vperm.slane %v2004_v62, 0 }
  0xaf   :  { %v346_v12 = vmax.f32 %v297_v5, 0.0  ;;  %v1679_v5 = vld [vmem:[#allocation4 + $0x84] sm:$0xf] }
  0xb0   :  { %825 = vmatpush.bf16.msra.mxu0 %v1530_v3 }
  0xb2   :  { %v277_v33 = vpop.f32.mrf.mxu3 }
  0xb3   :  { %v269_v8 = vpop.f32.mrf.mxu0  ;;  %v278_v7 = vadd.f32 %v277_v33, %v1937_v63 }
  0xb4   :  { %v270_v9 = vadd.f32 %v269_v8, %v1937_v63  ;;  %v298_v10 = vpop.f32.mrf.mxu1  ;;  %v325_v11 = vpop.f32.mrf.mxu2 }
  0xb5   :  { %v299_v13 = vadd.f32 %v298_v10, %v1935_v61  ;;  %v326_v20 = vadd.f32 %v325_v11, %v1943_v14  ;;  %v1697_v10 = vld [vmem:[#allocation4 + $0x114] sm:$0xf]  ;;  %v1519_v11 = vld [vmem:[#allocation4 + $0x118] sm:$0xf0] }
  0xb6   :  { %v348_v16 = vmax.f32 %v270_v9, 0.0  ;;  %v1450_v9 = vor.u32 %v1679_v5, %v1447_v6 }
  0xb7   :  { %v349_v17 = vmax.f32 %v299_v13, 0.0  ;;  %v347_v29 = vmax.f32 %v326_v20, 0.0  ;;  %v357_v20 = vmax.f32 %v278_v7, 0.0 }
  0xb8   :  { %v369_v18 = vpack.c.bf16 %v348_v16, %v345_v15  ;;  %v1522_v15 = vor.u32 %v1697_v10, %v1519_v11  ;;  %798 = vmatpush.bf16.msra.mxu3 %v1450_v9  ;;  %v1725_v9 = vld [vmem:[%s2179_s5 + $0x70] sm:$0xff] }
  0xb9   :  { %v1945_v19 = vpack.c.bf16 %v349_v17, %v346_v12  ;;  %v1695_v17 = vld [vmem:[#allocation4 + $0x104] sm:$0xf] }
  0xba   :  { %683 = vmatmul.bf16.vlgmr.msrb.gmra.mxu3 %v369_v18  ;;  %770 = vmatmul.bf16.vlgmr.msrb.gmra.mxu2 %v369_v18  ;;  %v279_v55 = vpop.f32.mrf.mxu3  ;;  %v1511_v18 = vld [vmem:[#allocation4 + $0x108] sm:$0xf0] }
  0xbb   :  { %712 = vmatmul.bf16.vlgmr.msrb.gmra.mxu0 %v1945_v19  ;;  %v272_v21 = vpop.f32.mrf.mxu0  ;;  %v280_v8 = vadd.f32 %v279_v55, %v1937_v63  ;;  %v1514_v24 = vor.u32 %v1695_v17, %v1511_v18 }
  0xbc   :  { %v301_v25 = vpop.f32.mrf.mxu1  ;;  %v327_v26 = vpop.f32.mrf.mxu2  ;;  %v273_v42 = vadd.f32 %v272_v21, %v1937_v63  ;;  %826 = vmatpush.bf16.msra.mxu0 %v1522_v15 }
  0xbd   :  { %v328_v30 = vadd.f32 %v327_v26, %v1943_v14  ;;  %v302_v39 = vadd.f32 %v301_v25, %v1935_v61  ;;  %v360_v21 = vmax.f32 %v280_v8, 0.0 }
  0xbe   :  { %v351_v49 = vmax.f32 %v273_v42, 0.0 }
  0xbf   :  { %v350_v32 = vmax.f32 %v328_v30, 0.0  ;;  %v352_v47 = vmax.f32 %v302_v39, 0.0  ;;  %v375_v28 = vpack.c.bf16 %v360_v21, %v357_v20  ;;  %v1724_v21 = vld [vmem:[%s2179_s5 + $0x68] sm:$0xff] }
  0xc0   :  { %827 = vmatpush.bf16.msra.mxu0 %v1514_v24 }
  0xc1   :  { %v1951_v40 = vpack.c.bf16 %v350_v32, %v347_v29 }
  0xc2   :  { %v282_v16 = vpop.f32.mrf.mxu3 }
  0xc3   :  { %v274_v43 = vpop.f32.mrf.mxu0  ;;  %741 = vmatmul.bf16.vlgmr.msrb.gmra.mxu1 %v1951_v40  ;;  %v283_v37 = vadd.f32 %v282_v16, %v1937_v63 }
  0xc4   :  { %v275_v44 = vadd.f32 %v274_v43, %v1937_v63  ;;  %v303_v45 = vpop.f32.mrf.mxu1  ;;  %v330_v46 = vpop.f32.mrf.mxu2 }
  0xc5   :  { %v304_v48 = vadd.f32 %v303_v45, %v1935_v61  ;;  %v331_v53 = vadd.f32 %v330_v46, %v1943_v14  ;;  %v363_v42 = vmax.f32 %v283_v37, 0.0 }
  0xc6   :  { %v354_v50 = vmax.f32 %v275_v44, 0.0 }
  0xc7   :  { %v355_v51 = vmax.f32 %v304_v48, 0.0  ;;  %v353_v1 = vmax.f32 %v331_v53, 0.0 }
  0xc8   :  { %v372_v52 = vpack.c.bf16 %v354_v50, %v351_v49 }
  0xc9   :  { %v1958_v54 = vpack.c.bf16 %v355_v51, %v352_v47 }
  0xca   :  { %688 = vmatmul.bf16.gmra.mxu3 %v372_v52  ;;  %775 = vmatmul.bf16.gmra.mxu2 %v372_v52  ;;  %v284_v34 = vpop.f32.mrf.mxu3 }
  0xcb   :  { %717 = vmatmul.bf16.gmra.mxu0 %v1958_v54  ;;  %v285_v38 = vadd.f32 %v284_v34, %v1937_v63 }
  0xcc   :  { %v306_v59 = vpop.f32.mrf.mxu1  ;;  %v332_v60 = vpop.f32.mrf.mxu2 }
  0xcd   :  { %v333_v2 = vadd.f32 %v332_v60, %v1943_v14  ;;  %v307_v12 = vadd.f32 %v306_v59, %v1935_v61  ;;  %v366_v43 = vmax.f32 %v285_v38, 0.0  ;;  %v1711_v59 = vld [vmem:[%s2179_s5] sm:$0xff]  ;;  %v1722_v38 = vld [vmem:[%s2179_s5 + $0x58] sm:$0xff] }
  0xcf   :  { %v356_v4 = vmax.f32 %v333_v2, 0.0  ;;  %v358_v25 = vmax.f32 %v307_v12, 0.0  ;;  %v378_v49 = vpack.c.bf16 %v366_v43, %v363_v42  ;;  %v1726_v2 = vld [vmem:[%s2179_s5 + $0x78] sm:$0xff]  ;;  %v1721_v43 = vld [vmem:[%s2179_s5 + $0x50] sm:$0xff] }
  0xd0   :  { %1034 = vmatpush.bf16.msra.mxu2 %v1726_v2  ;;  %1743 = vmatpush.bf16.msrb.mxu3 %v1726_v2 }
  0xd1   :  { %v374_v13 = vpack.c.bf16 %v356_v4, %v353_v1 }
  0xd3   :  { %746 = vmatmul.bf16.gmra.mxu1 %v374_v13 }
  0xd4   :  { %v308_v22 = vpop.f32.mrf.mxu1  ;;  %v335_v23 = vpop.f32.mrf.mxu2  ;;  %1035 = vmatpush.bf16.msra.mxu2 %v1725_v9  ;;  %1744 = vmatpush.bf16.msrb.mxu3 %v1725_v9 }
  0xd5   :  { %v309_v26 = vadd.f32 %v308_v22, %v1935_v61  ;;  %v336_v29 = vadd.f32 %v335_v23, %v1943_v14 }
  0xd7   :  { %v361_v27 = vmax.f32 %v309_v26, 0.0  ;;  %v359_v33 = vmax.f32 %v336_v29, 0.0 }
  0xd8   :  { %1036 = vmatpush.bf16.msra.mxu2 %v1724_v21  ;;  %1745 = vmatpush.bf16.msrb.mxu3 %v1724_v21 }
  0xd9   :  { %v376_v30 = vpack.c.bf16 %v361_v27, %v358_v25 }
  0xda   :  { %693 = vmatmul.bf16.gmra.mxu3 %v375_v28  ;;  %780 = vmatmul.bf16.gmra.mxu2 %v375_v28  ;;  %v1723_v28 = vld [vmem:[%s2179_s5 + $0x60] sm:$0xff] }
  0xdb   :  { %722 = vmatmul.bf16.gmra.mxu0 %v376_v30 }
  0xdc   :  { %v311_v31 = vpop.f32.mrf.mxu1  ;;  %v337_v32 = vpop.f32.mrf.mxu2  ;;  %1037 = vmatpush.bf16.msra.mxu2 %v1723_v28  ;;  %1746 = vmatpush.bf16.msrb.mxu3 %v1723_v28 }
  0xdd   :  { %v338_v35 = vadd.f32 %v337_v32, %v1943_v14  ;;  %v312_v39 = vadd.f32 %v311_v31, %v1935_v61 }
  0xdf   :  { %v362_v36 = vmax.f32 %v338_v35, 0.0  ;;  %v364_v46 = vmax.f32 %v312_v39, 0.0 }
  0xe0   :  { %1038 = vmatpush.bf16.msra.mxu2 %v1722_v38  ;;  %1747 = vmatpush.bf16.msrb.mxu3 %v1722_v38 }
  0xe1   :  { %v377_v41 = vpack.c.bf16 %v362_v36, %v359_v33 }
  0xe3   :  { %751 = vmatmul.bf16.gmra.mxu1 %v377_v41 }
  0xe4   :  { %v313_v44 = vpop.f32.mrf.mxu1  ;;  %v340_v45 = vpop.f32.mrf.mxu2  ;;  %1039 = vmatpush.bf16.msra.mxu2 %v1721_v43  ;;  %1748 = vmatpush.bf16.msrb.mxu3 %v1721_v43 }
  0xe5   :  { %v314_v47 = vadd.f32 %v313_v44, %v1935_v61  ;;  %v341_v50 = vadd.f32 %v340_v45, %v1943_v14  ;;  %v1718_v61 = vld [vmem:[%s2179_s5 + $0x38] sm:$0xff] }
  0xe6   :  { %1005 = vmatpush.bf16.msrb.mxu0 %v1718_v61  ;;  %1735 = vmatpush.bf16.msra.mxu1 %v1718_v61 }
  0xe7   :  { %v367_v48 = vmax.f32 %v314_v47, 0.0  ;;  %v365_v52 = vmax.f32 %v341_v50, 0.0  ;;  %v1720_v47 = vld [vmem:[%s2179_s5 + $0x48] sm:$0xff] }
  0xe8   :  { %1040 = vmatpush.bf16.msra.mxu2 %v1720_v47  ;;  %1749 = vmatpush.bf16.msrb.mxu3 %v1720_v47 }
  0xe9   :  { %v379_v51 = vpack.c.bf16 %v367_v48, %v364_v46 }
  0xea   :  { %698 = vmatmul.bf16.gmra.mxu3 %v378_v49  ;;  %785 = vmatmul.bf16.gmra.mxu2 %v378_v49 }
  0xeb   :  { %727 = vmatmul.bf16.gmra.mxu0 %v379_v51  ;;  %1736 = vmatpush.bf16.msra.mxu1 %v1717_v57 }
  0xec   :  { %v342_v63 = vpop.f32.mrf.mxu2  ;;  %1006 = vmatpush.bf16.msrb.mxu0 %v1717_v57 }
  0xed   :  { %v343_v53 = vadd.f32 %v342_v63, %v1943_v14  ;;  %v1716_v14 = vld [vmem:[%s2179_s5 + $0x28] sm:$0xff] }
  0xef   :  { %v368_v55 = vmax.f32 %v343_v53, 0.0  ;;  %1737 = vmatpush.bf16.msra.mxu1 %v1716_v14 }
  0xf0   :  { %1007 = vmatpush.bf16.msrb.mxu0 %v1716_v14 }
  0xf1   :  { %v380_v56 = vpack.c.bf16 %v368_v55, %v365_v52  ;;  %v1719_v52 = vld [vmem:[%s2179_s5 + $0x40] sm:$0xff] }
  0xf2   :  { %1041 = vmatpush.bf16.msra.mxu2 %v1719_v52  ;;  %1750 = vmatpush.bf16.msrb.mxu3 %v1719_v52 }
  0xf3   :  { %756 = vmatmul.bf16.gmra.mxu1 %v380_v56 }
  0xfa   :  { %799 = vmatmul.bf16.vlgmr.msra.gmra.mxu3 %v1945_v19  ;;  %v1715_v19 = vld [vmem:[%s2179_s5 + $0x20] sm:$0xff] }
  0xfb   :  { %828 = vmatmul.bf16.vlgmr.msra.gmra.mxu0 %v1951_v40  ;;  %1738 = vmatpush.bf16.msra.mxu1 %v1715_v19  ;;  %v1714_v40 = vld [vmem:[%s2179_s5 + $0x18] sm:$0xff] }
  0xfc   :  { %1008 = vmatpush.bf16.msrb.mxu0 %v1715_v19 }
  0xff   :  { %1739 = vmatpush.bf16.msra.mxu1 %v1714_v40 }
 0x100   :  { %1009 = vmatpush.bf16.msrb.mxu0 %v1714_v40 }
 0x10a   :  { %804 = vmatmul.bf16.gmra.mxu3 %v1958_v54  ;;  %v1713_v54 = vld [vmem:[%s2179_s5 + $0x10] sm:$0xff] }
 0x10b   :  { %833 = vmatmul.bf16.gmra.mxu0 %v374_v13  ;;  %1740 = vmatpush.bf16.msra.mxu1 %v1713_v54 }
 0x10c   :  { %1010 = vmatpush.bf16.msrb.mxu0 %v1713_v54 }
 0x10f   :  { %1741 = vmatpush.bf16.msra.mxu1 %v1712_v58 }
 0x110   :  { %1011 = vmatpush.bf16.msrb.mxu0 %v1712_v58 }
 0x113   :  { %1742 = vmatpush.bf16.msra.mxu1 %v1711_v59 }
 0x114   :  { %1012 = vmatpush.bf16.msrb.mxu0 %v1711_v59 }
 0x11a   :  { %809 = vmatmul.bf16.gmra.mxu3 %v376_v30 }
 0x11b   :  { %838 = vmatmul.bf16.gmra.mxu0 %v377_v41 }
 0x12a   :  { %814 = vmatmul.bf16.gmra.mxu3 %v379_v51 }
 0x12b   :  { %843 = vmatmul.bf16.gmra.mxu0 %v380_v56 }
 0x138   :  { %v713_v60 = vpop.f32.mrf.mxu0 }
 0x13d   :  { %v684_v1 = vpop.f32.mrf.mxu3  ;;  %v771_v53 = vpop.f32.mrf.mxu2 }
 0x13e   :  { %v685_v3 = vadd.f32 %v684_v1, %v2007_v0 }
 0x140   :  { %v715_v4 = vpop.f32.mrf.mxu0  ;;  %v742_v5 = vpop.f32.mrf.mxu1  ;;  %v714_v6 = vadd.f32 %v713_v60, %v685_v3 }
 0x142   :  { %v743_v10 = vadd.f32 %v742_v5, %v714_v6  ;;  %v432_v6 = vperm.slane %v2004_v62, 1 }
 0x144   :  { %v849_v16 = vmax.f32 %v743_v10, 0.0 }
 0x145   :  { %v686_v7 = vpop.f32.mrf.mxu3  ;;  %v773_v58 = vpop.f32.mrf.mxu2 }
 0x146   :  { %v687_v8 = vadd.f32 %v686_v7, %v2007_v0 }
 0x148   :  { %v718_v11 = vpop.f32.mrf.mxu0  ;;  %v716_v12 = vadd.f32 %v715_v4, %v687_v8  ;;  %v744_v13 = vpop.f32.mrf.mxu1 }
 0x14a   :  { %v745_v15 = vadd.f32 %v744_v13, %v716_v12  ;;  %v772_v12 = vadd.f32 %v771_v53, %v432_v6 }
 0x14c   :  { %v851_v17 = vmax.f32 %v745_v15, 0.0 }
 0x14d   :  { %v689_v18 = vpop.f32.mrf.mxu3 }
 0x14e   :  { %v865_v20 = vpack.c.bf16 %v851_v17, %v849_v16  ;;  %v690_v22 = vadd.f32 %v689_v18, %v2007_v0  ;;  %v774_v16 = vadd.f32 %v773_v58, %v432_v6 }
 0x150   :  { %v720_v23 = vpop.f32.mrf.mxu0  ;;  %1013 = vmatmul.bf16.vlgmr.msrb.gmra.mxu0 %v865_v20  ;;  %v747_v24 = vpop.f32.mrf.mxu1  ;;  %v719_v25 = vadd.f32 %v718_v11, %v690_v22 }
 0x151   :  { %v776_v11 = vpop.f32.mrf.mxu2 }
 0x152   :  { %v748_v29 = vadd.f32 %v747_v24, %v719_v25 }
 0x154   :  { %v853_v34 = vmax.f32 %v748_v29, 0.0 }
 0x155   :  { %v691_v26 = vpop.f32.mrf.mxu3 }
 0x156   :  { %v692_v27 = vadd.f32 %v691_v26, %v2007_v0  ;;  %v777_v26 = vadd.f32 %v776_v11, %v432_v6 }
 0x158   :  { %v723_v30 = vpop.f32.mrf.mxu0  ;;  %v721_v31 = vadd.f32 %v720_v23, %v692_v27  ;;  %v749_v32 = vpop.f32.mrf.mxu1 }
 0x159   :  { %v778_v22 = vpop.f32.mrf.mxu2 }
 0x15a   :  { %v750_v33 = vadd.f32 %v749_v32, %v721_v31 }
 0x15c   :  { %v855_v35 = vmax.f32 %v750_v33, 0.0 }
 0x15d   :  { %v694_v36 = vpop.f32.mrf.mxu3 }
 0x15e   :  { %v867_v37 = vpack.c.bf16 %v855_v35, %v853_v34  ;;  %v695_v39 = vadd.f32 %v694_v36, %v2007_v0 }
 0x160   :  { %v725_v41 = vpop.f32.mrf.mxu0  ;;  %1018 = vmatmul.bf16.vlgmr.msra.gmra.mxu1 %v867_v37  ;;  %v752_v42 = vpop.f32.mrf.mxu1  ;;  %v724_v44 = vadd.f32 %v723_v30, %v695_v39  ;;  %v779_v30 = vadd.f32 %v778_v22, %v432_v6 }
 0x161   :  { %v781_v29 = vpop.f32.mrf.mxu2 }
 0x162   :  { %v753_v48 = vadd.f32 %v752_v42, %v724_v44  ;;  %v782_v42 = vadd.f32 %v781_v29, %v432_v6 }
 0x164   :  { %v857_v55 = vmax.f32 %v753_v48, 0.0 }
 0x165   :  { %v696_v45 = vpop.f32.mrf.mxu3 }
 0x166   :  { %v697_v46 = vadd.f32 %v696_v45, %v2007_v0 }
 0x168   :  { %v728_v49 = vpop.f32.mrf.mxu0  ;;  %v726_v50 = vadd.f32 %v725_v41, %v697_v46  ;;  %v754_v51 = vpop.f32.mrf.mxu1 }
 0x169   :  { %v783_v39 = vpop.f32.mrf.mxu2 }
 0x16a   :  { %v755_v63 = vadd.f32 %v754_v51, %v726_v50  ;;  %v784_v45 = vadd.f32 %v783_v39, %v432_v6 }
 0x16c   :  { %v859_v56 = vmax.f32 %v755_v63, 0.0 }
 0x16d   :  { %v699_v61 = vpop.f32.mrf.mxu3 }
 0x16e   :  { %v869_v57 = vpack.c.bf16 %v859_v56, %v857_v55  ;;  %v700_v14 = vadd.f32 %v699_v61, %v2007_v0 }
 0x170   :  { %v730_v19 = vpop.f32.mrf.mxu0  ;;  %1023 = vmatmul.bf16.gmra.mxu1 %v869_v57  ;;  %v757_v40 = vpop.f32.mrf.mxu1  ;;  %v729_v54 = vadd.f32 %v728_v49, %v700_v14 }
 0x171   :  { %v786_v49 = vpop.f32.mrf.mxu2 }
 0x172   :  { %v758_v1 = vadd.f32 %v757_v40, %v729_v54  ;;  %v787_v56 = vadd.f32 %v786_v49, %v432_v6 }
 0x174   :  { %v861_v7 = vmax.f32 %v758_v1, 0.0 }
 0x175   :  { %v701_v59 = vpop.f32.mrf.mxu3 }
 0x176   :  { %v702_v60 = vadd.f32 %v701_v59, %v2007_v0 }
 0x178   :  { %v829_v2 = vpop.f32.mrf.mxu0  ;;  %v731_v3 = vadd.f32 %v730_v19, %v702_v60  ;;  %v759_v4 = vpop.f32.mrf.mxu1 }
 0x179   :  { %v788_v61 = vpop.f32.mrf.mxu2 }
 0x17a   :  { %v760_v5 = vadd.f32 %v759_v4, %v731_v3  ;;  %v789_v14 = vadd.f32 %v788_v61, %v432_v6  ;;  %v2045_v4 = vld [vmem:[%s2180_s6] ss:$0 sm:$0xff] }
 0x17c   :  { %v863_v8 = vmax.f32 %v760_v5, 0.0 }
 0x17d   :  { %v800_v9 = vpop.f32.mrf.mxu3 }
 0x17e   :  { %v871_v10 = vpack.c.bf16 %v863_v8, %v861_v7  ;;  %v801_v15 = vadd.f32 %v800_v9, %v772_v12 }
 0x180   :  { %v831_v13 = vpop.f32.mrf.mxu0  ;;  %1028 = vmatmul.bf16.gmra.mxu1 %v871_v10  ;;  %v830_v18 = vadd.f32 %v829_v2, %v801_v15 }
 0x182   :  { %v850_v23 = vmax.f32 %v830_v18, 0.0 }
 0x185   :  { %v802_v17 = vpop.f32.mrf.mxu3 }
 0x186   :  { %v803_v0 = vadd.f32 %v802_v17, %v774_v16 }
 0x188   :  { %v832_v20 = vadd.f32 %v831_v13, %v803_v0  ;;  %v834_v21 = vpop.f32.mrf.mxu0 }
 0x18a   :  { %v852_v24 = vmax.f32 %v832_v20, 0.0 }
 0x18c   :  { %v866_v25 = vpack.c.bf16 %v852_v24, %v850_v23  ;;  %v1063_v24 = vlaneseq }
 0x18d   :  { %v805_v62 = vpop.f32.mrf.mxu3 }
 0x18e   :  { %1042 = vmatmul.bf16.vlgmr.msra.gmra.mxu2 %v866_v25  ;;  %v806_v28 = vadd.f32 %v805_v62, %v777_v26  ;;  %v2059_v29 = vand.u32 127, %v1063_v24 }
 0x190   :  { %v836_v27 = vpop.f32.mrf.mxu0  ;;  %v835_v32 = vadd.f32 %v834_v21, %v806_v28  ;;  %vm1234_vm0 = vcmp.ge.s32.totalorder %v2059_v29, 7  ;;  %vm1235_vm1 = vcmp.lt.s32.totalorder %v2059_v29, 10  ;;  %vm1233_vm6 = vcmp.lt.s32.totalorder %v2059_v29, 3 }
 0x191   :  { %vm2069_vm4 = vmand %vm1234_vm0, %vm1235_vm1 }
 0x192   :  { %v854_v36 = vmax.f32 %v835_v32, 0.0 }
 0x195   :  { %v807_v31 = vpop.f32.mrf.mxu3 }
 0x196   :  { %v808_v33 = vadd.f32 %v807_v31, %v779_v30 }
 0x198   :  { %v837_v34 = vadd.f32 %v836_v27, %v808_v33  ;;  %v839_v35 = vpop.f32.mrf.mxu0 }
 0x19a   :  { %v856_v37 = vmax.f32 %v837_v34, 0.0 }
 0x19c   :  { %v868_v38 = vpack.c.bf16 %v856_v37, %v854_v36 }
 0x19d   :  { %v810_v41 = vpop.f32.mrf.mxu3 }
 0x19e   :  { %1047 = vmatmul.bf16.gmra.mxu2 %v868_v38  ;;  %v811_v43 = vadd.f32 %v810_v41, %v782_v42 }
 0x1a0   :  { %v841_v44 = vpop.f32.mrf.mxu0  ;;  %v840_v47 = vadd.f32 %v839_v35, %v811_v43 }
 0x1a2   :  { %v858_v51 = vmax.f32 %v840_v47, 0.0 }
 0x1a5   :  { %v812_v46 = vpop.f32.mrf.mxu3 }
 0x1a6   :  { %v813_v48 = vadd.f32 %v812_v46, %v784_v45 }
 0x1a8   :  { %v842_v50 = vadd.f32 %v841_v44, %v813_v48  ;;  %v844_v53 = vpop.f32.mrf.mxu0 }
 0x1aa   :  { %v860_v63 = vmax.f32 %v842_v50, 0.0 }
 0x1ac   :  { %v870_v52 = vpack.c.bf16 %v860_v63, %v858_v51 }
 0x1ad   :  { %v815_v55 = vpop.f32.mrf.mxu3 }
 0x1ae   :  { %1052 = vmatmul.bf16.gmra.mxu2 %v870_v52  ;;  %v816_v57 = vadd.f32 %v815_v55, %v787_v56 }
 0x1b0   :  { %v845_v40 = vadd.f32 %v844_v53, %v816_v57  ;;  %v846_v58 = vpop.f32.mrf.mxu0 }
 0x1b2   :  { %v862_v60 = vmax.f32 %v845_v40, 0.0 }
 0x1b5   :  { %v817_v19 = vpop.f32.mrf.mxu3 }
 0x1b6   :  { %v818_v54 = vadd.f32 %v817_v19, %v789_v14 }
 0x1b8   :  { %v847_v59 = vadd.f32 %v846_v58, %v818_v54 }
 0x1ba   :  { %v864_v1 = vmax.f32 %v847_v59, 0.0 }
 0x1bc   :  { %v872_v2 = vpack.c.bf16 %v864_v1, %v862_v60 }
 0x1be   :  { %1057 = vmatmul.bf16.vlgmr.msrb.gmra.mxu3 %v872_v2 }
 0x1cd   :  { %v1014_v3 = vpop.f32.mrf.mxu0 }
 0x1ce   :  { %v1015_v5 = vadd.f32 %v2045_v4, %v1014_v3 }
 0x1d5   :  { %v1016_v10 = vpop.f32.mrf.mxu0 }
 0x1d6   :  { %v1017_v12 = vadd.f32 %v2045_v4, %v1016_v10 }
 0x1dd   :  { %v1019_v8 = vpop.f32.mrf.mxu1 }
 0x1de   :  { %v1020_v21 = vadd.f32 %v2045_v4, %v1019_v8 }
 0x1e5   :  { %v1021_v16 = vpop.f32.mrf.mxu1 }
 0x1e6   :  { %v1022_v31 = vadd.f32 %v2045_v4, %v1021_v16 }
 0x1ed   :  { %v1024_v26 = vpop.f32.mrf.mxu1 }
 0x1ee   :  { %v1025_v43 = vadd.f32 %v2045_v4, %v1024_v26 }
 0x1f5   :  { %v1026_v50 = vpop.f32.mrf.mxu1 }
 0x211   :  { %v1043_v7 = vpop.f32.mrf.mxu2 }
 0x212   :  { %v2048_v6 = vadd.f32 %v1043_v7, %v1015_v5  ;;  %v1027_v5 = vadd.f32 %v2045_v4, %v1026_v50 }
 0x214   :  { %v1081_v9 = vsub.f32 0.0, %v2048_v6 }
 0x216   :  { %v1089_v11 = vmul.f32 1.442695, %v1081_v9 }
 0x218   :  { %1758 = vpow2.f32 %v1089_v11 }
 0x219   :  { %v1045_v13 = vpop.f32.mrf.mxu2 }
 0x21a   :  { %v2052_v15 = vadd.f32 %v1045_v13, %v1017_v12  ;;  %v1029_v13 = vpop.f32.mrf.mxu1 }
 0x21c   :  { %v1082_v17 = vsub.f32 0.0, %v2052_v15 }
 0x21e   :  { %v1759_v18 = vpop.eup %1758  ;;  %v1091_v0 = vmul.f32 1.442695, %v1082_v17 }
 0x21f   :  { %v1105_v20 = vadd.f32 1.0, %v1759_v18 }
 0x220   :  { %1760 = vpow2.f32 %v1091_v0 }
 0x221   :  { %1762 = vrcp.f32 %v1105_v20  ;;  %v1048_v22 = vpop.f32.mrf.mxu2  ;;  %v1124_v36 = vand.u32 2147483648, %v1105_v20  ;;  %v1122_v38 = vand.u32 2147483647, %v1105_v20  ;;  %vm1118_vm3 = vweird.f32 %v1105_v20 }
 0x222   :  { %v2056_v23 = vadd.f32 %v1048_v22, %v1020_v21  ;;  %1764 = vtanh.f32 %v2048_v6 }
 0x223   :  { %v1125_v48 = vor.u32 1.1754944e-38, %v1124_v36  ;;  %vm1123_vm7 = vcmp.eq.f32.partialorder %v1122_v38, 8.507059e+37 }
 0x224   :  { %v1083_v25 = vsub.f32 0.0, %v2056_v23 }
 0x226   :  { %v1761_v62 = vpop.eup %1760  ;;  %v1093_v27 = vmul.f32 1.442695, %v1083_v25 }
 0x227   :  { %v1763_v28 = vpop.eup %1762  ;;  %v1106_v30 = vadd.f32 1.0, %v1761_v62 }
 0x228   :  { %v1114_v32 = vmul.f32 %v1763_v28, %v1105_v20  ;;  %1766 = vpow2.f32 %v1093_v27  ;;  %vm1119_vm2 = vweird.f32 %v1763_v28  ;;  %v1765_v41 = vpop.eup %1764 }
 0x229   :  { %1768 = vrcp.f32 %v1106_v30  ;;  %v1050_v33 = vpop.f32.mrf.mxu2  ;;  %vm1120_vm5 = vmor %vm1118_vm3, %vm1119_vm2  ;;  %v1073_v52 = vmul.f32 0.1, %v1765_v41  ;;  %v1139_v19 = vand.u32 2147483648, %v1106_v30  ;;  %v1137_v54 = vand.u32 2147483647, %v1106_v30 }
 0x22a   :  { %v1115_v34 = vsub.f32 1.0, %v1114_v32  ;;  %v2063_v35 = vadd.f32 %v1050_v33, %v1022_v31  ;;  %1770 = vtanh.f32 %v2052_v15  ;;  %vm1133_vm9 = vweird.f32 %v1106_v30 }
 0x22b   :  { %v1140_v7 = vor.u32 1.1754944e-38, %v1139_v19  ;;  %vm1138_vm11 = vcmp.eq.f32.partialorder %v1137_v54, 8.507059e+37 }
 0x22c   :  { %v1116_v37 = vmul.f32 %v1763_v28, %v1115_v34  ;;  %v1084_v39 = vsub.f32 0.0, %v2063_v35 }
 0x22e   :  { %v1767_v42 = vpop.eup %1766  ;;  %v1117_v44 = vadd.f32 %v1763_v28, %v1116_v37  ;;  %v1095_v46 = vmul.f32 1.442695, %v1084_v39 }
 0x22f   :  { %v1769_v47 = vpop.eup %1768  ;;  %v2075_v49 = vadd.f32 1.0, %v1767_v42 }
 0x230   :  { %v1121_v51 = vsel %vm1120_vm5, %v1763_v28, %v1117_v44  ;;  %v1129_v63 = vmul.f32 %v1769_v47, %v1106_v30  ;;  %1772 = vpow2.f32 %v1095_v46  ;;  %vm1134_vm8 = vweird.f32 %v1769_v47  ;;  %v1771_v59 = vpop.eup %1770  ;;  %v1031_v44 = vpop.f32.mrf.mxu1 }
 0x231   :  { %v1126_v53 = vsel %vm1123_vm7, %v1125_v48, %v1121_v51  ;;  %1774 = vrcp.f32 %v2075_v49  ;;  %v1053_v55 = vpop.f32.mrf.mxu2  ;;  %vm1135_vm10 = vmor %vm1133_vm9, %vm1134_vm8  ;;  %v1074_v10 = vmul.f32 0.1, %v1771_v59  ;;  %v1154_v20 = vand.u32 2147483648, %v2075_v49 }
 0x232   :  { %v1237_v56 = vsel %vm2069_vm4, %v1126_v53, %v2048_v6  ;;  %v1130_v61 = vsub.f32 1.0, %v1129_v63  ;;  %v2081_v57 = vadd.f32 %v1053_v55, %v1025_v43  ;;  %1776 = vtanh.f32 %v2056_v23 }
 0x233   :  { %v1245_v14 = vsel %vm1233_vm6, %v1073_v52, %v1237_v56  ;;  %v1152_v22 = vand.u32 2147483647, %v2075_v49  ;;  %vm1148_vm13 = vweird.f32 %v2075_v49  ;;  %v1030_v28 = vadd.f32 %v2045_v4, %v1029_v13 }
 0x234   :  { %1253 = vst [vmem:[%s2181_s7] sm:$0xff] %v1245_v14  ;;  %v1131_v40 = vmul.f32 %v1769_v47, %v1130_v61  ;;  %v1085_v58 = vsub.f32 0.0, %v2081_v57  ;;  %v1155_v30 = vor.u32 1.1754944e-38, %v1154_v20  ;;  %v1032_v52 = vadd.f32 %v2045_v4, %v1031_v44 }
 0x235   :  { %vm1153_vm15 = vcmp.eq.f32.partialorder %v1152_v22, 8.507059e+37 }
 0x236   :  { %v1773_v60 = vpop.eup %1772  ;;  %v1132_v1 = vadd.f32 %v1769_v47, %v1131_v40  ;;  %v1097_v2 = vmul.f32 1.442695, %v1085_v58 }
 0x237   :  { %v1775_v3 = vpop.eup %1774  ;;  %v2091_v8 = vadd.f32 1.0, %v1773_v60 }
 0x238   :  { %v1136_v6 = vsel %vm1135_vm10, %v1769_v47, %v1132_v1  ;;  %v1144_v9 = vmul.f32 %v1775_v3, %v2075_v49  ;;  %1778 = vpow2.f32 %v1097_v2  ;;  %vm1149_vm12 = vweird.f32 %v1775_v3  ;;  %v1777_v25 = vpop.eup %1776 }
 0x239   :  { %v1141_v11 = vsel %vm1138_vm11, %v1140_v7, %v1136_v6  ;;  %1780 = vrcp.f32 %v2091_v8  ;;  %v1055_v12 = vpop.f32.mrf.mxu2  ;;  %vm1150_vm14 = vmor %vm1148_vm13, %vm1149_vm12  ;;  %v1075_v34 = vmul.f32 0.1, %v1777_v25  ;;  %v1169_v43 = vand.u32 2147483648, %v2091_v8 }
 0x23a   :  { %v1238_v16 = vsel %vm2069_vm4, %v1141_v11, %v2052_v15  ;;  %v1145_v17 = vsub.f32 1.0, %v1144_v9  ;;  %v2098_v18 = vadd.f32 %v1055_v12, %v1027_v5  ;;  %1782 = vtanh.f32 %v2063_v35 }
 0x23b   :  { %v1246_v0 = vsel %vm1233_vm6, %v1074_v10, %v1238_v16  ;;  %v1167_v47 = vand.u32 2147483647, %v2091_v8  ;;  %vm1163_vm1 = vweird.f32 %v2091_v8  ;;  %v1170_v53 = vor.u32 1.1754944e-38, %v1169_v43 }
 0x23c   :  { %1254 = vst [vmem:[%s2181_s7 + $0x8] sm:$0xff] %v1246_v0  ;;  %v1146_v21 = vmul.f32 %v1775_v3, %v1145_v17  ;;  %v1086_v24 = vsub.f32 0.0, %v2098_v18 }
 0x23d   :  { %vm1168_vm3 = vcmp.eq.f32.partialorder %v1167_v47, 8.507059e+37 }
 0x23e   :  { %v1779_v15 = vpop.eup %1778  ;;  %v1147_v62 = vadd.f32 %v1775_v3, %v1146_v21  ;;  %v1099_v26 = vmul.f32 1.442695, %v1086_v24 }
 0x23f   :  { %v1781_v27 = vpop.eup %1780  ;;  %v1109_v31 = vadd.f32 1.0, %v1779_v15 }
 0x240   :  { %v1151_v32 = vsel %vm1150_vm14, %v1775_v3, %v1147_v62  ;;  %v1159_v33 = vmul.f32 %v1781_v27, %v2091_v8  ;;  %1784 = vpow2.f32 %v1099_v26  ;;  %vm1164_vm0 = vweird.f32 %v1781_v27 }
 0x241   :  { %v1156_v36 = vsel %vm1153_vm15, %v1155_v30, %v1151_v32  ;;  %1786 = vrcp.f32 %v1109_v31  ;;  %v1058_v37 = vpop.f32.mrf.mxu3  ;;  %vm1165_vm2 = vmor %vm1163_vm1, %vm1164_vm0  ;;  %v1184_v60 = vand.u32 2147483648, %v1109_v31  ;;  %v1182_v2 = vand.u32 2147483647, %v1109_v31 }
 0x242   :  { %v1239_v38 = vsel %vm2069_vm4, %v1156_v36, %v2056_v23  ;;  %v1160_v39 = vsub.f32 1.0, %v1159_v33  ;;  %v2115_v41 = vadd.f32 %v1058_v37, %v1030_v28  ;;  %v1783_v23 = vpop.eup %1782  ;;  %1788 = vtanh.f32 %v2081_v57 }
 0x243   :  { %v1247_v42 = vsel %vm1233_vm6, %v1075_v34, %v1239_v38  ;;  %v1076_v14 = vmul.f32 0.1, %v1783_v23  ;;  %vm1178_vm7 = vweird.f32 %v1109_v31  ;;  %v1185_v9 = vor.u32 1.1754944e-38, %v1184_v60 }
 0x244   :  { %1255 = vst [vmem:[%s2181_s7 + $0x10] sm:$0xff] %v1247_v42  ;;  %v1161_v46 = vmul.f32 %v1781_v27, %v1160_v39  ;;  %v1087_v48 = vsub.f32 0.0, %v2115_v41  ;;  %vm1183_vm9 = vcmp.eq.f32.partialorder %v1182_v2, 8.507059e+37 }
 0x246   :  { %v1785_v49 = vpop.eup %1784  ;;  %v1162_v50 = vadd.f32 %v1781_v27, %v1161_v46  ;;  %v1101_v51 = vmul.f32 1.442695, %v1087_v48 }
 0x247   :  { %v1787_v63 = vpop.eup %1786  ;;  %v1110_v55 = vadd.f32 1.0, %v1785_v49 }
 0x248   :  { %v1166_v56 = vsel %vm1165_vm2, %v1781_v27, %v1162_v50  ;;  %v1174_v61 = vmul.f32 %v1787_v63, %v1109_v31  ;;  %1790 = vpow2.f32 %v1101_v51  ;;  %vm1179_vm5 = vweird.f32 %v1787_v63  ;;  %v1789_v5 = vpop.eup %1788 }
 0x249   :  { %v1171_v19 = vsel %vm1168_vm3, %v1170_v53, %v1166_v56  ;;  %1792 = vrcp.f32 %v1110_v55  ;;  %v1060_v40 = vpop.f32.mrf.mxu3  ;;  %vm1180_vm8 = vmor %vm1178_vm7, %vm1179_vm5  ;;  %v1077_v13 = vmul.f32 0.1, %v1789_v5  ;;  %v1199_v21 = vand.u32 2147483648, %v1110_v55 }
 0x24a   :  { %v1240_v54 = vsel %vm2069_vm4, %v1171_v19, %v2063_v35  ;;  %v1175_v58 = vsub.f32 1.0, %v1174_v61  ;;  %v2131_v59 = vadd.f32 %v1060_v40, %v1032_v52  ;;  %1794 = vtanh.f32 %v2098_v18 }
 0x24b   :  { %v1248_v4 = vsel %vm1233_vm6, %v1076_v14, %v1240_v54  ;;  %v1197_v24 = vand.u32 2147483647, %v1110_v55  ;;  %vm1193_vm11 = vweird.f32 %v1110_v55  ;;  %v1200_v27 = vor.u32 1.1754944e-38, %v1199_v21 }
 0x24c   :  { %1256 = vst [vmem:[%s2181_s7 + $0x18] sm:$0xff] %v1248_v4  ;;  %v1176_v1 = vmul.f32 %v1787_v63, %v1175_v58  ;;  %v1088_v3 = vsub.f32 0.0, %v2131_v59 }
 0x24d   :  { %vm1198_vm13 = vcmp.eq.f32.partialorder %v1197_v24, 8.507059e+37 }
 0x24e   :  { %v1791_v7 = vpop.eup %1790  ;;  %v1177_v8 = vadd.f32 %v1787_v63, %v1176_v1  ;;  %v1103_v35 = vmul.f32 1.442695, %v1088_v3 }
 0x24f   :  { %v1793_v6 = vpop.eup %1792  ;;  %v1111_v10 = vadd.f32 1.0, %v1791_v7 }
 0x250   :  { %v1181_v11 = vsel %vm1180_vm8, %v1787_v63, %v1177_v8  ;;  %v1189_v12 = vmul.f32 %v1793_v6, %v1110_v55  ;;  %1796 = vpow2.f32 %v1103_v35  ;;  %vm1194_vm10 = vweird.f32 %v1793_v6  ;;  %v1795_v25 = vpop.eup %1794 }
 0x251   :  { %v1186_v16 = vsel %vm1183_vm9, %v1185_v9, %v1181_v11  ;;  %1798 = vrcp.f32 %v1111_v10  ;;  %vm1195_vm12 = vmor %vm1193_vm11, %vm1194_vm10  ;;  %v1078_v31 = vmul.f32 0.1, %v1795_v25  ;;  %v1214_v37 = vand.u32 2147483648, %v1111_v10 }
 0x252   :  { %v1241_v17 = vsel %vm2069_vm4, %v1186_v16, %v2081_v57  ;;  %v1190_v0 = vsub.f32 1.0, %v1189_v12  ;;  %1800 = vtanh.f32 %v2115_v41  ;;  %v1212_v39 = vand.u32 2147483647, %v1111_v10 }
 0x253   :  { %v1249_v20 = vsel %vm1233_vm6, %v1077_v13, %v1241_v17  ;;  %vm1208_vm15 = vweird.f32 %v1111_v10  ;;  %v1215_v46 = vor.u32 1.1754944e-38, %v1214_v37 }
 0x254   :  { %1257 = vst [vmem:[%s2181_s7 + $0x20] sm:$0xff] %v1249_v20  ;;  %v1191_v22 = vmul.f32 %v1793_v6, %v1190_v0  ;;  %vm1213_vm1 = vcmp.eq.f32.partialorder %v1212_v39, 8.507059e+37 }
 0x256   :  { %v1797_v15 = vpop.eup %1796  ;;  %v1192_v62 = vadd.f32 %v1793_v6, %v1191_v22 }
 0x257   :  { %v1799_v26 = vpop.eup %1798  ;;  %v1112_v57 = vadd.f32 1.0, %v1797_v15 }
 0x258   :  { %v1196_v28 = vsel %vm1195_vm12, %v1793_v6, %v1192_v62  ;;  %v1204_v30 = vmul.f32 %v1799_v26, %v1111_v10  ;;  %vm1209_vm14 = vweird.f32 %v1799_v26  ;;  %v1801_v42 = vpop.eup %1800 }
 0x259   :  { %v1201_v32 = vsel %vm1198_vm13, %v1200_v27, %v1196_v28  ;;  %1802 = vrcp.f32 %v1112_v57  ;;  %vm1210_vm0 = vmor %vm1208_vm15, %vm1209_vm14  ;;  %v1079_v48 = vmul.f32 0.1, %v1801_v42  ;;  %v1229_v63 = vand.u32 2147483648, %v1112_v57 }
 0x25a   :  { %v1242_v33 = vsel %vm2069_vm4, %v1201_v32, %v2098_v18  ;;  %v1205_v34 = vsub.f32 1.0, %v1204_v30  ;;  %1804 = vtanh.f32 %v2131_v59  ;;  %v1227_v53 = vand.u32 2147483647, %v1112_v57 }
 0x25b   :  { %v1250_v36 = vsel %vm1233_vm6, %v1078_v31, %v1242_v33  ;;  %vm1223_vm3 = vweird.f32 %v1112_v57  ;;  %v1230_v61 = vor.u32 1.1754944e-38, %v1229_v63 }
 0x25c   :  { %1258 = vst [vmem:[%s2181_s7 + $0x28] sm:$0xff] %v1250_v36  ;;  %v1206_v38 = vmul.f32 %v1799_v26, %v1205_v34  ;;  %vm1228_vm7 = vcmp.eq.f32.partialorder %v1227_v53, 8.507059e+37 }
 0x25e   :  { %v1207_v43 = vadd.f32 %v1799_v26, %v1206_v38 }
 0x25f   :  { %v1803_v44 = vpop.eup %1802 }
 0x260   :  { %v1211_v47 = vsel %vm1210_vm0, %v1799_v26, %v1207_v43  ;;  %v1219_v18 = vmul.f32 %v1803_v44, %v1112_v57  ;;  %vm1224_vm2 = vweird.f32 %v1803_v44  ;;  %v1805_v55 = vpop.eup %1804 }
 0x261   :  { %v1216_v23 = vsel %vm1213_vm1, %v1215_v46, %v1211_v47  ;;  %vm1225_vm5 = vmor %vm1223_vm3, %vm1224_vm2 }
 0x262   :  { %v1243_v49 = vsel %vm2069_vm4, %v1216_v23, %v2115_v41  ;;  %v1220_v50 = vsub.f32 1.0, %v1219_v18  ;;  %v1080_v41 = vmul.f32 0.1, %v1805_v55 }
 0x263   :  { %v1251_v51 = vsel %vm1233_vm6, %v1079_v48, %v1243_v49 }
 0x264   :  { %1259 = vst [vmem:[%s2181_s7 + $0x30] sm:$0xff] %v1251_v51  ;;  %v1221_v52 = vmul.f32 %v1803_v44, %v1220_v50 }
 0x266   :  { %v1222_v56 = vadd.f32 %v1803_v44, %v1221_v52 }
 0x268   :  { %v1226_v14 = vsel %vm1225_vm5, %v1803_v44, %v1222_v56 }
 0x269   :  { %v1231_v19 = vsel %vm1228_vm7, %v1230_v61, %v1226_v14 }
 0x26a   :  { %v1244_v40 = vsel %vm2069_vm4, %v1231_v19, %v2131_v59 }
 0x26b   :  { %v1252_v54 = vsel %vm1233_vm6, %v1080_v41, %v1244_v40 }
 0x26c   :  { %1260 = vst [vmem:[%s2181_s7 + $0x38] sm:$0xff] %v1252_v54 }
 0x26d   :  { %1265 = vsyncpa [#allocation3], 1 }
 0x26e   :  { %1266 = vsyncpa [#allocation5], 1 }

</bundles_post_ra>
